<compile_context>
chip_gen: v7x
topology: tpu7x:2x2x1
jax: 0.10.0
libtpu: 0.0.40
codegen_flags: <defaults>
</compile_context>

<pallas_src>
import jax
import jax.numpy as jnp
from jax.experimental import pallas as pl
from jax.experimental.pallas import tpu as pltpu

LANE = 128                       # lane-pad the tiny num_labels dim of the weight
_VMEM_BUDGET = 8 * 1024 * 1024   # conservative: fits v5e's 16 MiB default scoped VMEM
_SMALL_B_FALLBACK = 64           # below this, plain XLA (dispatch overhead dominates)


def _nsp_head_kernel(x_ref, w_ref, b_ref, o_ref):
    # x_ref: [TB, H], w_ref: [H, LANE] (labels lane-padded), b_ref: [1, LANE] f32,
    # o_ref: [TB, num_labels]
    acc = jnp.dot(x_ref[...], w_ref[...], preferred_element_type=jnp.float32)
    acc = acc + b_ref[...]                       # bias add on the f32 accumulator
    o_ref[...] = acc[:, : o_ref.shape[-1]].astype(o_ref.dtype)


def prepare_nsp_params(weight, bias, dtype=None):
    """One-time parameter prep (hoisted out of the forward path).

    weight: [num_labels, H] (PyTorch nn.Linear layout), bias: [num_labels].
    Returns (w_pad [H, LANE], b_pad [1, LANE] f32, num_labels).
    """
    num_labels, H = weight.shape
    dtype = dtype if dtype is not None else weight.dtype
    w_pad = (
        jnp.zeros((H, LANE), dtype=dtype)
        .at[:, :num_labels]
        .set(weight.T.astype(dtype))
    )
    b_pad = (
        jnp.zeros((1, LANE), dtype=jnp.float32)
        .at[0, :num_labels]
        .set(bias.astype(jnp.float32))
    )
    return w_pad, b_pad, num_labels


def _pick_batch_tile(B, H, itemsize, block_b):
    """Largest sublane-aligned batch tile that fits the VMEM budget, split in
    two when possible so v7x's two TensorCores both participate."""
    fixed = 2 * H * LANE * itemsize                   # weight (double-buffer bound)
    per_row = 2 * H * itemsize + 2 * LANE * 4         # x double-buffer + out block (f32 lanes)
    tb_budget = max(8, (_VMEM_BUDGET - fixed) // per_row)
    tb = min(block_b, int(tb_budget), B)
    if B >= 16:                                       # ensure >=2 grid steps (v7x megacore)
        tb = min(tb, -(-B // 2))
    if tb < B:
        tb = max(8, (tb // 8) * 8)                    # sublane-aligned partial blocks
    return tb


def nsp_head_apply(pooled_output, w_pad, b_pad, num_labels, *,
                   block_b=512, force_pallas=False):
    """pooled_output: [B, H]; (w_pad, b_pad, num_labels) from prepare_nsp_params."""
    B, H = pooled_output.shape
    out_dtype = pooled_output.dtype

    # Align weight dtype with activations (tiny tensor; avoids implicit upcast
    # of the streamed x tile inside the kernel).
    if w_pad.dtype != pooled_output.dtype:
        w_pad = w_pad.astype(pooled_output.dtype)

    # Tiny-batch fallback: let XLA fuse this sub-microsecond op with neighbors.
    # TODO(synk): for best perf, fuse this head into the preceding pooler matmul.
    if B < _SMALL_B_FALLBACK and not force_pallas:
        out = pooled_output @ w_pad[:, :num_labels] + b_pad[0, :num_labels]
        return out.astype(out_dtype)

    tb = _pick_batch_tile(B, H, pooled_output.dtype.itemsize, block_b)
    grid = (pl.cdiv(B, tb),)

    itemsize = pooled_output.dtype.itemsize
    cost = pl.CostEstimate(
        flops=2 * B * H * num_labels,
        transcendentals=0,
        bytes_accessed=B * H * itemsize            # streamed x (dominant)
        + H * LANE * itemsize                      # resident padded weight (read once)
        + B * num_labels * itemsize,               # trimmed output
    )

    return pl.pallas_call(
        _nsp_head_kernel,
        out_shape=jax.ShapeDtypeStruct((B, num_labels), out_dtype),
        grid_spec=pltpu.PrefetchScalarGridSpec(
            num_scalar_prefetch=0,
            grid=grid,
            in_specs=[
                pl.BlockSpec((tb, H), lambda i: (i, 0)),      # x: streamed batch tiles
                pl.BlockSpec((H, LANE), lambda i: (0, 0)),    # weight: resident
                pl.BlockSpec((1, LANE), lambda i: (0, 0)),    # bias: resident
            ],
            out_specs=pl.BlockSpec((tb, num_labels), lambda i: (i, 0)),
        ),
        compiler_params=pltpu.CompilerParams(
            dimension_semantics=("parallel",),  # independent batch tiles (megacore OK)
        ),
        cost_estimate=cost,
    )(pooled_output, w_pad, b_pad)


def nsp_head(pooled_output, weight, bias, **kwargs):
    """Convenience wrapper (prep + apply). Prefer calling prepare_nsp_params once."""
    w_pad, b_pad, num_labels = prepare_nsp_params(weight, bias)
    return nsp_head_apply(pooled_output, w_pad, b_pad, num_labels, **kwargs)


if __name__ == "__main__":
    key = jax.random.PRNGKey(0)
    k_x, k_w, k_b, k_x2 = jax.random.split(key, 4)

    # --- small-shape check (matches module spec: Linear(hidden_size, 2)) ---
    batch = 2
    hidden_size = 32
    num_labels = 2

    pooled_output = jax.random.normal(k_x, (batch, hidden_size), dtype=jnp.float32)
    weight = jax.random.normal(k_w, (num_labels, hidden_size), dtype=jnp.float32) * 0.02
    bias = jax.random.normal(k_b, (num_labels,), dtype=jnp.float32) * 0.02

    w_pad, b_pad, nl = prepare_nsp_params(weight, bias)  # one-time param prep

    # Force the Pallas path so the kernel itself is exercised at small shapes.
    out = jax.block_until_ready(
        nsp_head_apply(pooled_output, w_pad, b_pad, nl, force_pallas=True)
    )
    ref = pooled_output @ weight.T + bias
    assert out.shape == (batch, num_labels)
    assert jnp.allclose(out, ref, atol=1e-5, rtol=1e-5)

    # Small-batch fallback path (plain XLA) must also match.
    out_fb = jax.block_until_ready(nsp_head_apply(pooled_output, w_pad, b_pad, nl))
    assert jnp.allclose(out_fb, ref, atol=1e-5, rtol=1e-5)

    # --- tiled-path check (batch > tile, partial final block, multi-step grid) ---
    batch2, hidden2 = 1040, 128
    x2 = jax.random.normal(k_x2, (batch2, hidden2), dtype=jnp.float32)
    w2 = jax.random.normal(k_w, (num_labels, hidden2), dtype=jnp.float32) * 0.02
    b2 = jax.random.normal(k_b, (num_labels,), dtype=jnp.float32) * 0.02

    w2_pad, b2_pad, nl2 = prepare_nsp_params(w2, b2)
    out2 = jax.block_until_ready(
        nsp_head_apply(x2, w2_pad, b2_pad, nl2, block_b=512)
    )
    ref2 = x2 @ w2.T + b2
    assert out2.shape == (batch2, num_labels)
    assert jnp.allclose(out2, ref2, atol=1e-4, rtol=1e-4)

    print("KERNEL_OK")
</pallas_src>

<mosaic_0001>
module attributes {stable_mosaic.version = 11 : i64} {
  func.func @_nsp_head_kernel(%arg0: i32, %arg1: memref<2x32xf32, #tpu.memory_space<vmem>>, %arg2: memref<32x128xf32, #tpu.memory_space<vmem>>, %arg3: memref<1x128xf32, #tpu.memory_space<vmem>>, %arg4: memref<2x2xf32, #tpu.memory_space<vmem>>) attributes {dimension_semantics = [#tpu.dimension_semantics<parallel>], iteration_bounds = array<i64: 1>, scalar_prefetch = 0 : i64, scratch_operands = 0 : i64, tpu.core_type = #tpu.core_type<tc>, window_params = [{transform_indices = @transform_0, window_bounds = array<i64: 2, 32>}, {pipeline_mode = #tpu.pipeline_mode<synchronous>, transform_indices = @transform_1, window_bounds = array<i64: 32, 128>}, {pipeline_mode = #tpu.pipeline_mode<synchronous>, transform_indices = @transform_2, window_bounds = array<i64: 1, 128>}, {transform_indices = @transform_3, window_bounds = array<i64: 2, 2>}]} {
    %c0 = arith.constant 0 : index
    %c0_0 = arith.constant 0 : index
    %0 = vector.load %arg1[%c0, %c0_0] : memref<2x32xf32, #tpu.memory_space<vmem>>, vector<2x32xf32>
    %c0_1 = arith.constant 0 : index
    %c0_2 = arith.constant 0 : index
    %1 = vector.load %arg2[%c0_1, %c0_2] : memref<32x128xf32, #tpu.memory_space<vmem>>, vector<32x128xf32>
    %cst = arith.constant dense<0.000000e+00> : vector<2x128xf32>
    %2 = tpu.matmul %0, %1, %cst {dimension_numbers = #tpu.dot_dimension_numbers<[1], [0], [0], [1], [0, 0, 1, 1], [], []>} : vector<2x32xf32>, vector<32x128xf32>, vector<2x128xf32> -> vector<2x128xf32>
    %c0_3 = arith.constant 0 : index
    %c0_4 = arith.constant 0 : index
    %3 = vector.load %arg3[%c0_3, %c0_4] : memref<1x128xf32, #tpu.memory_space<vmem>>, vector<1x128xf32>
    %4 = vector.broadcast %3 : vector<1x128xf32> to vector<2x128xf32>
    %5 = arith.addf %2, %4 : vector<2x128xf32>
    %6 = vector.extract_strided_slice %5 {offsets = [0, 0], sizes = [2, 2], strides = [1, 1]} : vector<2x128xf32> to vector<2x2xf32>
    %c0_5 = arith.constant 0 : index
    %c0_6 = arith.constant 0 : index
    %7 = vector.load %arg4[%c0_5, %c0_6] : memref<2x2xf32, #tpu.memory_space<vmem>>, vector<2x2xf32>
    tpu.vector_store %arg4[%c0_5, %c0_6], %6 {strides = array<i32>} : memref<2x2xf32, #tpu.memory_space<vmem>>, vector<2x2xf32>,
    return
  }
  func.func @transform_0(%arg0: i32) -> (i32, i32) {
    %c0_i32 = arith.constant 0 : i32
    %c0_i32_0 = arith.constant 0 : i32
    return %arg0, %c0_i32 : i32, i32
  }
  func.func @transform_1(%arg0: i32) -> (i32, i32) {
    %c0_i32 = arith.constant 0 : i32
    %c0_i32_0 = arith.constant 0 : i32
    %c0_i32_1 = arith.constant 0 : i32
    return %c0_i32, %c0_i32_0 : i32, i32
  }
  func.func @transform_2(%arg0: i32) -> (i32, i32) {
    %c0_i32 = arith.constant 0 : i32
    %c0_i32_0 = arith.constant 0 : i32
    %c0_i32_1 = arith.constant 0 : i32
    return %c0_i32, %c0_i32_0 : i32, i32
  }
  func.func @transform_3(%arg0: i32) -> (i32, i32) {
    %c0_i32 = arith.constant 0 : i32
    %c0_i32_0 = arith.constant 0 : i32
    return %arg0, %c0_i32 : i32, i32
  }
}

</mosaic_0001>

<bundles_post_ra>
// kernel: tpu_custom_call.1
= control target key start
LH: loop header
LB: loop body
LE: loop exit
PB: predicated region body
PF: predicated region fallthrough
CT: control target
= control target key end

     0   :  { %8 = vsyncpa [#allocation3], 0  ;;  %s323_s0 = inlined_call_operand.hbm [shape: f32[2,32], index: 0, kind: input, shape index: {}]   ;;  %s324_s1 = inlined_call_operand.hbm [shape: f32[32,128], index: 1, kind: input, shape index: {}]   ;;  %s325_s2 = inlined_call_operand.vmem [shape: f32[1,128], index: 2, kind: input, shape index: {}]   ;;  %s326_s3 = inlined_call_operand.hbm [shape: f32[2,2], index: 3, kind: output, shape index: {}]  }
   0x1   :  { %9 = vsyncpa [#allocation6], 0 }
   0x2   :  { %10 = vsyncpa [#allocation4], 0  ;;  %s249_s12 = smov [#allocation2]   ;;  %s250_s14 = smov [#allocation5]  }
   0x3   :  { %s17_s13 = sshll.u32 %s249_s12, 4  ;;  %s26_s15 = sshll.u32 %s250_s14, 4  ;;  %s18_s13 = int_to_ptr.vmem [resolvable:$true] %s17_s13  ;;  %s277_s15 = int_to_ptr.vmem [resolvable:$true] %s26_s15 }
   0x4   :  { %s177_s18 = scalar_lea.hbm %s323_s0, 32 }
   0x5   :  { %p178_p0 = scmp.ne.s32.totalorder %s323_s0, %s177_s18  ;;  %p181_p1 = scmp.lt.u32.totalorder %s177_s18, %s323_s0 }
   0x7   :  { %p183_p2 = pnand %p181_p1, %p178_p0 }
   0x9   :  { %186 = shalt.err (!%p183_p2)
}
   0xa   :  { %s187_s23 = scalar_lea.vmem %s18_s13, 32  ;;  %p192_p4 = scmp.lt.s32.totalorder %s18_s13, %s18_s13 }
   0xb   :  { %p188_p3 = scmp.ne.s32.totalorder %s18_s13, %s187_s23  ;;  %p193_p5 = scmp.lt.s32.totalorder %s187_s23, %s187_s23 }
   0xd   :  { %p194_p6 = por %p193_p5, %p192_p4 }
   0xf   :  { %p195_p7 = pnand %p194_p6, %p188_p3 }
  0x11   :  { %198 = shalt.err (!%p195_p7)
}
  0x12   :  { %20 = dma.hbm_to_vmem [thread:$0]  %s323_s0, 32, %s18_s13, [#allocation3]  }
  0x13   :  { %s199_s28 = scalar_lea.hbm %s324_s1, 512 }
  0x14   :  { %p200_p8 = scmp.ne.s32.totalorder %s324_s1, %s199_s28  ;;  %p203_p9 = scmp.lt.u32.totalorder %s199_s28, %s324_s1 }
  0x16   :  { %p205_p10 = pnand %p203_p9, %p200_p8 }
  0x18   :  { %208 = shalt.err (!%p205_p10)
}
  0x19   :  { %s209_s6 = scalar_lea.vmem %s277_s15, 512  ;;  %p214_p12 = scmp.lt.s32.totalorder %s277_s15, %s277_s15 }
  0x1a   :  { %p210_p11 = scmp.ne.s32.totalorder %s277_s15, %s209_s6  ;;  %p215_p13 = scmp.lt.s32.totalorder %s209_s6, %s209_s6 }
  0x1c   :  { %p216_p0 = por %p215_p13, %p214_p12 }
  0x1e   :  { %p217_p1 = pnand %p216_p0, %p210_p11 }
  0x20   :  { %220 = shalt.err (!%p217_p1)
}
  0x21   :  { %s251_s0 = smov 128   ;;  %s252_s7 = smov 8  }
  0x22   :  { %32 = dma.hbm_to_vmem [thread:$0]  %s324_s1, 512, %s277_s15, [#allocation6], %s251_s0, %s251_s0, %s252_s7  }
  0x23   :  { %243 = dma.done.wait [#allocation3], 32  }
  0x24   :  { %244 = vsyncadd [#allocation3], 4294967264 }
  0x25   :  { %245 = dma.done.wait [#allocation6], 512  }
  0x26   :  { %246 = vsyncadd [#allocation6], 4294966784  ;;  %v253_v0 = vmov 0.0|0.0   ;;  %vm254_vm0 = vmmov 0   ;;  %v255_v1 = vmov 0.0   ;;  %v42_v2 = vld [vmem:[#allocation5] sm:$0xff] }
  0x27   :  { %163 = vmatprep.subr.bf16.mxu0 %v253_v0  ;;  %160 = vmatprep.mubr.msk.f32.mxu0 %vm254_vm0, %v255_v1  ;;  %v43_v3 = vld [vmem:[#allocation5 + $0x8] sm:$0xff]  ;;  %v44_v4 = vld [vmem:[#allocation5 + $0x10] sm:$0xff]  ;;  %v45_v6 = vld [vmem:[#allocation5 + $0x18] sm:$0xff]  ;;  %vm53_vm1 = vcmask 261120   ;;  %s256_s11 = smov [#allocation7]   ;;  %vm127_vm2 = vcmask 9216  }
  0x28   :  { %v164_v5 = vpack.c.bf16 %v43_v3, %v42_v2  ;;  %v167_v7 = vpack.c.bf16 %v45_v6, %v44_v4  ;;  %v41_v8 = vld [vmem:[#allocation2] sm:$0x3]  ;;  %s135_s12 = sshll.u32 %s256_s11, 4  ;;  %s136_s12 = int_to_ptr.vmem [resolvable:$true] %s135_s12 }
  0x29   :  { %v145_v9 = vld [vmem:[%s325_s2] ss:$0 sm:$0xff]  ;;  %s221_s13 = scalar_lea.vmem %s136_s12, 32  ;;  %p226_p3 = scmp.lt.s32.totalorder %s136_s12, %s136_s12 }
  0x2a   :  { %165 = vmatpush3.bf16.msra.mxu0 %v164_v5  ;;  %p222_p2 = scmp.ne.s32.totalorder %s136_s12, %s221_s13  ;;  %p227_p4 = scmp.lt.s32.totalorder %s221_s13, %s221_s13 }
  0x2b   :  { %166 = vmatprep.subr.bf16.mxu0 %v253_v0 }
  0x2c   :  { %p228_p5 = por %p227_p4, %p226_p3 }
  0x2e   :  { %168 = vmatpush3.bf16.msra.mxu0 %v167_v7  ;;  %p229_p6 = pnand %p228_p5, %p222_p2 }
  0x31   :  { %161 = vmatmul.mubr.msk.f32.vlgmr.msra.gmra.mrb[0].mxu0 %vm53_vm1, %v41_v8 }
 0x104   :  { %v123_v10 = vpop.f32.mrb[0].mxu0 }
 0x105   :  { %v124_v11 = vadd.f32 %v145_v9, %v123_v10  ;;  %v162_v12 = vpop.f32.mrb[1].mxu0 }
 0x107   :  { %128 = vst.msk [vmem:[#allocation7] sm:$0x3] %vm127_vm2, %v124_v11 }
 0x108   :  { %232 = shalt.err (!%p229_p6)
}
 0x109   :  { %s233_s16 = scalar_lea.hbm %s326_s3, 32 }
 0x10a   :  { %p234_p7 = scmp.ne.s32.totalorder %s326_s3, %s233_s16  ;;  %p237_p8 = scmp.lt.u32.totalorder %s233_s16, %s326_s3 }
 0x10c   :  { %p239_p9 = pnand %p237_p8, %p234_p7 }
 0x10e   :  { %242 = shalt.err (!%p239_p9)
}
 0x10f   :  { %138 = dma.vmem_to_hbm [thread:$0]  %s136_s12, 32, %s326_s3, [#allocation4]  }
 0x110   :  { %247 = dma.done.wait [#allocation4], 32  }
 0x111   :  { %248 = vsyncadd [#allocation4], 4294967264 }
 0x112   :  { %142 = vsyncpa [#allocation3], 1 }
 0x113   :  { %143 = vsyncpa [#allocation6], 1 }
 0x114   :  { %144 = vsyncpa [#allocation4], 1 }

</bundles_post_ra>
